<compile_context>
chip_gen: v7x
topology: tpu7x:2x2x1
jax: 0.10.0
libtpu: 0.0.40
codegen_flags: <defaults>
</compile_context>

<pallas_src>
import functools

import jax
import jax.numpy as jnp
import numpy as np
from jax import lax
from jax.experimental import pallas as pl
from jax.experimental.pallas import tpu as pltpu


# ----------------------------- Pallas kernel --------------------------------


def _attention_kernel(covw_ref, gamma_ref, beta_ref, w_in_ref, w_out_ref, b_out_ref,
                      qkv_ref, o_ref, out_buf_ref, *, heads, dim_head, variant, scale):
    """Fused LayerNorm -> Linear -> (cosine|softmax) attention -> output Linear.

    One query-set (all heads) per grid step.
      qkv_ref     : [1, 3N, dim]   (q rows, then k rows, then v rows)
      w_in_ref    : [dim, inner_dim]
      w_out_ref   : [inner_dim, out_dim]
      b_out_ref   : [1, out_dim]
      o_ref       : [1, N, out_dim]
      out_buf_ref : VMEM scratch [N, inner_dim]  (per-head results, lane-concatenated)
    """
    gamma = gamma_ref[...].astype(jnp.float32)        # [1, dim]
    beta = beta_ref[...].astype(jnp.float32)          # [1, dim]

    # ---- stacked LayerNorm over q|k|v rows (one broadcast of gamma/beta) ----
    slab = qkv_ref[0].astype(jnp.float32)              # [3N, dim]
    mu = jnp.mean(slab, axis=-1, keepdims=True)
    var = jnp.mean((slab - mu) ** 2, axis=-1, keepdims=True)
    slab_n = (slab - mu) * lax.rsqrt(var + 1e-5) * gamma + beta

    # ---- single input projection for all heads and all of q/k/v ----
    proj = jnp.dot(slab_n, w_in_ref[...].astype(jnp.float32),
                   preferred_element_type=jnp.float32)  # [3N, inner_dim]

    n = qkv_ref.shape[1] // 3
    fq_all = proj[0:n]                                  # [N, inner_dim]
    fk_all = proj[n:2 * n]
    fv_all = proj[2 * n:3 * n]

    contract_last = (((1,), (1,)), ((), ()))            # 'nd,md->nm' (no fk transpose tile)
    inv_d = 1.0 / dim_head

    if variant == "cosine":
        w = covw_ref[0]                                  # sigmoid(fixed_cov_weight)
        one_minus_w = 1.0 - w                            # hoisted out of the head loop

    # heads is small & static: unrolled loop over per-head static lane slices.
    for h in range(heads):
        lo, hi = h * dim_head, (h + 1) * dim_head
        fq = fq_all[:, lo:hi]                            # [N, D]
        fk = fk_all[:, lo:hi]
        fv = fv_all[:, lo:hi]

        if variant == "cosine":
            dots = lax.dot_general(fq, fk, contract_last,
                                   preferred_element_type=jnp.float32)   # [N, N]
            # row-wise rsqrt (EUP) instead of an N x N divide; eps^2 guard on squared sums
            inv_q = lax.rsqrt(jnp.maximum(jnp.sum(fq * fq, axis=-1, keepdims=True), 1e-16))
            inv_k = lax.rsqrt(jnp.maximum(jnp.sum(fk * fk, axis=-1, keepdims=True), 1e-16))
            cosine_sim = dots * inv_q * inv_k.T
            mu_q = jnp.mean(fq, axis=-1, keepdims=True)                  # [N, 1]
            mu_k = jnp.mean(fk, axis=-1, keepdims=True)
            # (fq-mu_q)(fk-mu_k)^T = fq fk^T - D mu_q mu_k^T  ->  reuse `dots`
            cov = dots * inv_d - mu_q * mu_k.T
            attn = one_minus_w * cosine_sim + w * cov
        else:
            # pre-scale fq (N*D mults instead of N*N); exact softmax normalization
            dots = lax.dot_general(fq * scale, fk, contract_last,
                                   preferred_element_type=jnp.float32)   # [N, N]
            m = jnp.max(dots, axis=-1, keepdims=True)
            e = jnp.exp(dots - m)
            attn = e / jnp.sum(e, axis=-1, keepdims=True)

        out_h = jnp.dot(attn, fv, preferred_element_type=jnp.float32)    # [N, D]
        out_buf_ref[:, lo:hi] = out_h                   # lane-concatenate per-head results

    # ---- single fused output projection (+ bias), lane-dense [N, out_dim] store ----
    final = jnp.dot(out_buf_ref[...], w_out_ref[...].astype(jnp.float32),
                    preferred_element_type=jnp.float32) + b_out_ref[...].astype(jnp.float32)
    o_ref[0] = final.astype(o_ref.dtype)


# ------------------------------ module wrapper ------------------------------


def init_params(key, dim, heads, dim_head, initial_cov_weight=0.9):
    inner_dim = heads * dim_head
    k1, k2, k3 = jax.random.split(key, 3)
    params = {
        "ln_gamma": jnp.ones((dim,), jnp.float32),
        "ln_beta": jnp.zeros((dim,), jnp.float32),
        "w_in": jax.random.normal(k1, (dim, inner_dim), jnp.float32) / jnp.sqrt(dim),
        "fixed_cov_weight": jnp.asarray(initial_cov_weight, jnp.float32),
    }
    project_out = not (heads == 1 and dim_head == dim)
    if project_out:
        params["w_out"] = jax.random.normal(k2, (inner_dim, dim), jnp.float32) / jnp.sqrt(inner_dim)
        params["b_out"] = 0.01 * jax.random.normal(k3, (dim,), jnp.float32)
    return params


def attention_forward(params, q, k, v, *, heads, dim_head, variant):
    """q, k, v: [Q, N, dim] (matches the 'q n (h d)' rearrange convention)."""
    Qs, N, dim = q.shape
    inner_dim = heads * dim_head

    # Flat weights (no per-head reshapes / transposes needed any more).
    w_in = params["w_in"]                                # [dim, inner_dim]
    if "w_out" in params:
        w_out = params["w_out"]                           # [inner_dim, dim]
        b_out = params["b_out"].reshape(1, -1)
    else:
        # project_out == False implies heads == 1 and dim_head == dim -> identity projection.
        w_out = jnp.eye(inner_dim, dtype=jnp.float32)
        b_out = jnp.zeros((1, inner_dim), jnp.float32)
    out_dim = w_out.shape[-1]

    gamma = params["ln_gamma"].reshape(1, dim)
    beta = params["ln_beta"].reshape(1, dim)

    if variant == "cosine":
        covw = jax.nn.sigmoid(params["fixed_cov_weight"]).reshape(1).astype(jnp.float32)
    else:
        covw = jnp.zeros((1,), jnp.float32)               # unused in the softmax variant

    # Stack q|k|v rows -> one DMA per grid step and one LayerNorm / input projection.
    qkv = jnp.concatenate([q, k, v], axis=1)              # [Qs, 3N, dim]

    kernel = functools.partial(_attention_kernel, heads=heads, dim_head=dim_head,
                               variant=variant, scale=dim_head ** (-0.5))

    return pl.pallas_call(
        kernel,
        out_shape=jax.ShapeDtypeStruct((Qs, N, out_dim), q.dtype),
        grid=(Qs,),
        in_specs=[
            pl.BlockSpec(memory_space=pltpu.MemorySpace.SMEM),   # cov weight scalar
            pl.BlockSpec(memory_space=pltpu.MemorySpace.VMEM),   # ln gamma   [1, dim]
            pl.BlockSpec(memory_space=pltpu.MemorySpace.VMEM),   # ln beta    [1, dim]
            pl.BlockSpec(memory_space=pltpu.MemorySpace.VMEM),   # w_in       [dim, inner]
            pl.BlockSpec(memory_space=pltpu.MemorySpace.VMEM),   # w_out      [inner, out]
            pl.BlockSpec(memory_space=pltpu.MemorySpace.VMEM),   # b_out      [1, out]
            pl.BlockSpec((1, 3 * N, dim), lambda i: (i, 0, 0)),  # stacked q|k|v
        ],
        out_specs=pl.BlockSpec((1, N, out_dim), lambda i: (i, 0, 0)),
        scratch_shapes=[pltpu.VMEM((N, inner_dim), jnp.float32)],
        compiler_params=pltpu.CompilerParams(dimension_semantics=("parallel",)),
    )(covw, gamma, beta, w_in, w_out, b_out, qkv)


# --------------------------- pure-JAX reference -----------------------------


def _input_linear(params, t):
    mu = jnp.mean(t, axis=-1, keepdims=True)
    var = jnp.mean((t - mu) ** 2, axis=-1, keepdims=True)
    tn = (t - mu) / jnp.sqrt(var + 1e-5)
    tn = tn * params["ln_gamma"] + params["ln_beta"]
    return tn @ params["w_in"]


def attention_reference(params, q, k, v, *, heads, dim_head, variant):
    Qs, N, _ = q.shape

    def split_heads(t):
        return jnp.transpose(t.reshape(Qs, N, heads, dim_head), (2, 0, 1, 3))

    fq, fk, fv = (split_heads(_input_linear(params, t)) for t in (q, k, v))
    if variant == "cosine":
        dots = jnp.einsum("hqnd,hqmd->hqnm", fq, fk)
        qn = jnp.linalg.norm(fq, axis=-1)
        kn = jnp.linalg.norm(fk, axis=-1)
        cosine_sim = dots / (qn[..., :, None] * kn[..., None, :])
        qc = fq - fq.mean(axis=-1, keepdims=True)
        kc = fk - fk.mean(axis=-1, keepdims=True)
        cov = jnp.einsum("hqnd,hqmd->hqnm", qc, kc) / dim_head
        w = jax.nn.sigmoid(params["fixed_cov_weight"])
        attn = (1.0 - w) * cosine_sim + w * cov
    else:
        attn = jax.nn.softmax(jnp.einsum("hqnd,hqmd->hqnm", fq, fk) * dim_head ** (-0.5), axis=-1)
    out = jnp.einsum("hqnm,hqmd->hqnd", attn, fv)
    out = jnp.transpose(out, (1, 2, 0, 3)).reshape(Qs, N, heads * dim_head)
    if "w_out" in params:
        out = out @ params["w_out"] + params["b_out"]
    return out


# ---------------------------------- main ------------------------------------

if __name__ == "__main__":
    dim, heads, dim_head = 32, 4, 8     # inner_dim = 32
    Qs, N = 2, 8                        # q (query-sets), n (tokens)

    key = jax.random.PRNGKey(0)
    kp, kq, kk, kv = jax.random.split(key, 4)
    params = init_params(kp, dim, heads, dim_head, initial_cov_weight=0.9)
    q = jax.random.normal(kq, (Qs, N, dim), jnp.float32)
    k = jax.random.normal(kk, (Qs, N, dim), jnp.float32)
    v = jax.random.normal(kv, (Qs, N, dim), jnp.float32)

    out_cos = attention_forward(params, q, k, v, heads=heads, dim_head=dim_head, variant="cosine")
    out_dot = attention_forward(params, q, k, v, heads=heads, dim_head=dim_head, variant="dot")
    jax.block_until_ready((out_cos, out_dot))

    ref_cos = attention_reference(params, q, k, v, heads=heads, dim_head=dim_head, variant="cosine")
    ref_dot = attention_reference(params, q, k, v, heads=heads, dim_head=dim_head, variant="dot")
    np.testing.assert_allclose(np.asarray(out_cos), np.asarray(ref_cos), rtol=2e-3, atol=2e-3)
    np.testing.assert_allclose(np.asarray(out_dot), np.asarray(ref_dot), rtol=2e-3, atol=2e-3)

    print("KERNEL_OK")
</pallas_src>

<mosaic_0001>
module attributes {stable_mosaic.version = 11 : i64} {
  func.func @_attention_kernel(%arg0: i32, %arg1: memref<1xf32, #tpu.memory_space<smem>>, %arg2: memref<1x32xf32, #tpu.memory_space<vmem>>, %arg3: memref<1x32xf32, #tpu.memory_space<vmem>>, %arg4: memref<32x32xf32, #tpu.memory_space<vmem>>, %arg5: memref<32x32xf32, #tpu.memory_space<vmem>>, %arg6: memref<1x32xf32, #tpu.memory_space<vmem>>, %arg7: memref<1x24x32xf32, #tpu.memory_space<vmem>>, %arg8: memref<1x8x32xf32, #tpu.memory_space<vmem>>, %arg9: memref<8x32xf32, #tpu.memory_space<vmem>>) attributes {dimension_semantics = [#tpu.dimension_semantics<parallel>], iteration_bounds = array<i64: 2>, scalar_prefetch = 0 : i64, scratch_operands = 1 : i64, tpu.core_type = #tpu.core_type<tc>, window_params = [{transform_indices = @transform_0, window_bounds = array<i64: 1>}, {pipeline_mode = #tpu.pipeline_mode<synchronous>, transform_indices = @transform_1, window_bounds = array<i64: 1, 32>}, {pipeline_mode = #tpu.pipeline_mode<synchronous>, transform_indices = @transform_2, window_bounds = array<i64: 1, 32>}, {pipeline_mode = #tpu.pipeline_mode<synchronous>, transform_indices = @transform_3, window_bounds = array<i64: 32, 32>}, {pipeline_mode = #tpu.pipeline_mode<synchronous>, transform_indices = @transform_4, window_bounds = array<i64: 32, 32>}, {pipeline_mode = #tpu.pipeline_mode<synchronous>, transform_indices = @transform_5, window_bounds = array<i64: 1, 32>}, {transform_indices = @transform_6, window_bounds = array<i64: 1, 24, 32>}, {transform_indices = @transform_7, window_bounds = array<i64: 1, 8, 32>}]} {
    %c0 = arith.constant 0 : index
    %c0_0 = arith.constant 0 : index
    %0 = vector.load %arg2[%c0, %c0_0] : memref<1x32xf32, #tpu.memory_space<vmem>>, vector<1x32xf32>
    %c0_1 = arith.constant 0 : index
    %c0_2 = arith.constant 0 : index
    %1 = vector.load %arg3[%c0_1, %c0_2] : memref<1x32xf32, #tpu.memory_space<vmem>>, vector<1x32xf32>
    %c0_3 = arith.constant 0 : index
    %c0_4 = arith.constant 0 : index
    %c0_5 = arith.constant 0 : index
    %2 = vector.load %arg7[%c0_3, %c0_4, %c0_5] : memref<1x24x32xf32, #tpu.memory_space<vmem>>, vector<1x24x32xf32>
    %3 = vector.shape_cast %2 : vector<1x24x32xf32> to vector<24x32xf32>
    %cst = arith.constant dense<0.000000e+00> : vector<24xf32>
    %4 = vector.multi_reduction <add>, %3, %cst [1] : vector<24x32xf32> to vector<24xf32>
    %5 = vector.shape_cast %4 : vector<24xf32> to vector<24x1xf32>
    %cst_6 = arith.constant 3.200000e+01 : f32
    %6 = vector.broadcast %cst_6 : f32 to vector<24x1xf32>
    %7 = arith.divf %5, %6 : vector<24x1xf32>
    %8 = vector.broadcast %7 : vector<24x1xf32> to vector<24x32xf32>
    %9 = arith.subf %3, %8 : vector<24x32xf32>
    %10 = arith.mulf %9, %9 : vector<24x32xf32>
    %cst_7 = arith.constant dense<0.000000e+00> : vector<24xf32>
    %11 = vector.multi_reduction <add>, %10, %cst_7 [1] : vector<24x32xf32> to vector<24xf32>
    %12 = vector.shape_cast %11 : vector<24xf32> to vector<24x1xf32>
    %cst_8 = arith.constant 3.200000e+01 : f32
    %13 = vector.broadcast %cst_8 : f32 to vector<24x1xf32>
    %14 = arith.divf %12, %13 : vector<24x1xf32>
    %15 = vector.broadcast %7 : vector<24x1xf32> to vector<24x32xf32>
    %16 = arith.subf %3, %15 : vector<24x32xf32>
    %cst_9 = arith.constant 9.99999974E-6 : f32
    %17 = vector.broadcast %cst_9 : f32 to vector<24x1xf32>
    %18 = arith.addf %14, %17 : vector<24x1xf32>
    %19 = math.rsqrt %18 : vector<24x1xf32>
    %20 = vector.broadcast %19 : vector<24x1xf32> to vector<24x32xf32>
    %21 = arith.mulf %16, %20 : vector<24x32xf32>
    %22 = vector.broadcast %0 : vector<1x32xf32> to vector<24x32xf32>
    %23 = arith.mulf %21, %22 : vector<24x32xf32>
    %24 = vector.broadcast %1 : vector<1x32xf32> to vector<24x32xf32>
    %25 = arith.addf %23, %24 : vector<24x32xf32>
    %c0_10 = arith.constant 0 : index
    %c0_11 = arith.constant 0 : index
    %26 = vector.load %arg4[%c0_10, %c0_11] : memref<32x32xf32, #tpu.memory_space<vmem>>, vector<32x32xf32>
    %cst_12 = arith.constant dense<0.000000e+00> : vector<24x32xf32>
    %27 = tpu.matmul %25, %26, %cst_12 {dimension_numbers = #tpu.dot_dimension_numbers<[1], [0], [0], [1], [0, 0, 1, 1], [], []>} : vector<24x32xf32>, vector<32x32xf32>, vector<24x32xf32> -> vector<24x32xf32>
    %28 = vector.extract_strided_slice %27 {offsets = [0, 0], sizes = [8, 32], strides = [1, 1]} : vector<24x32xf32> to vector<8x32xf32>
    %29 = vector.extract_strided_slice %27 {offsets = [8, 0], sizes = [8, 32], strides = [1, 1]} : vector<24x32xf32> to vector<8x32xf32>
    %30 = vector.extract_strided_slice %27 {offsets = [16, 0], sizes = [8, 32], strides = [1, 1]} : vector<24x32xf32> to vector<8x32xf32>
    %c0_13 = arith.constant 0 : index
    %31 = memref.load %arg1[%c0_13] : memref<1xf32, #tpu.memory_space<smem>>
    %cst_14 = arith.constant 1.000000e+00 : f32
    %32 = arith.subf %cst_14, %31 : f32
    %33 = vector.extract_strided_slice %28 {offsets = [0, 0], sizes = [8, 8], strides = [1, 1]} : vector<8x32xf32> to vector<8x8xf32>
    %34 = vector.extract_strided_slice %29 {offsets = [0, 0], sizes = [8, 8], strides = [1, 1]} : vector<8x32xf32> to vector<8x8xf32>
    %35 = vector.extract_strided_slice %30 {offsets = [0, 0], sizes = [8, 8], strides = [1, 1]} : vector<8x32xf32> to vector<8x8xf32>
    %cst_15 = arith.constant dense<0.000000e+00> : vector<8x8xf32>
    %36 = tpu.matmul %33, %34, %cst_15 {dimension_numbers = #tpu.dot_dimension_numbers<[1], [1], [0], [0], [0, 0, 1, 0], [], []>} : vector<8x8xf32>, vector<8x8xf32>, vector<8x8xf32> -> vector<8x8xf32>
    %37 = arith.mulf %33, %33 : vector<8x8xf32>
    %cst_16 = arith.constant dense<0.000000e+00> : vector<8xf32>
    %38 = vector.multi_reduction <add>, %37, %cst_16 [1] : vector<8x8xf32> to vector<8xf32>
    %39 = vector.shape_cast %38 : vector<8xf32> to vector<8x1xf32>
    %cst_17 = arith.constant 1.000000e-16 : f32
    %40 = vector.broadcast %cst_17 : f32 to vector<8x1xf32>
    %41 = arith.maximumf %39, %40 : vector<8x1xf32>
    %42 = math.rsqrt %41 : vector<8x1xf32>
    %43 = arith.mulf %34, %34 : vector<8x8xf32>
    %cst_18 = arith.constant dense<0.000000e+00> : vector<8xf32>
    %44 = vector.multi_reduction <add>, %43, %cst_18 [1] : vector<8x8xf32> to vector<8xf32>
    %45 = vector.shape_cast %44 : vector<8xf32> to vector<8x1xf32>
    %cst_19 = arith.constant 1.000000e-16 : f32
    %46 = vector.broadcast %cst_19 : f32 to vector<8x1xf32>
    %47 = arith.maximumf %45, %46 : vector<8x1xf32>
    %48 = math.rsqrt %47 : vector<8x1xf32>
    %49 = vector.broadcast %42 : vector<8x1xf32> to vector<8x8xf32>
    %50 = arith.mulf %36, %49 : vector<8x8xf32>
    %51 = tpu.transpose %48, [1, 0] : vector<8x1xf32> -> vector<1x8xf32>
    %52 = vector.broadcast %51 : vector<1x8xf32> to vector<8x8xf32>
    %53 = arith.mulf %50, %52 : vector<8x8xf32>
    %cst_20 = arith.constant dense<0.000000e+00> : vector<8xf32>
    %54 = vector.multi_reduction <add>, %33, %cst_20 [1] : vector<8x8xf32> to vector<8xf32>
    %55 = vector.shape_cast %54 : vector<8xf32> to vector<8x1xf32>
    %cst_21 = arith.constant 8.000000e+00 : f32
    %56 = vector.broadcast %cst_21 : f32 to vector<8x1xf32>
    %57 = arith.divf %55, %56 : vector<8x1xf32>
    %cst_22 = arith.constant dense<0.000000e+00> : vector<8xf32>
    %58 = vector.multi_reduction <add>, %34, %cst_22 [1] : vector<8x8xf32> to vector<8xf32>
    %59 = vector.shape_cast %58 : vector<8xf32> to vector<8x1xf32>
    %cst_23 = arith.constant 8.000000e+00 : f32
    %60 = vector.broadcast %cst_23 : f32 to vector<8x1xf32>
    %61 = arith.divf %59, %60 : vector<8x1xf32>
    %cst_24 = arith.constant 1.250000e-01 : f32
    %62 = vector.broadcast %cst_24 : f32 to vector<8x8xf32>
    %63 = arith.mulf %36, %62 : vector<8x8xf32>
    %64 = tpu.transpose %61, [1, 0] : vector<8x1xf32> -> vector<1x8xf32>
    %65 = vector.broadcast %57 : vector<8x1xf32> to vector<8x8xf32>
    %66 = vector.broadcast %64 : vector<1x8xf32> to vector<8x8xf32>
    %67 = arith.mulf %65, %66 : vector<8x8xf32>
    %68 = arith.subf %63, %67 : vector<8x8xf32>
    %69 = vector.broadcast %32 : f32 to vector<8x8xf32>
    %70 = arith.mulf %69, %53 : vector<8x8xf32>
    %71 = vector.broadcast %31 : f32 to vector<8x8xf32>
    %72 = arith.mulf %71, %68 : vector<8x8xf32>
    %73 = arith.addf %70, %72 : vector<8x8xf32>
    %cst_25 = arith.constant dense<0.000000e+00> : vector<8x8xf32>
    %74 = tpu.matmul %73, %35, %cst_25 {dimension_numbers = #tpu.dot_dimension_numbers<[1], [0], [0], [1], [0, 0, 1, 1], [], []>} : vector<8x8xf32>, vector<8x8xf32>, vector<8x8xf32> -> vector<8x8xf32>
    %c0_26 = arith.constant 0 : index
    %c0_27 = arith.constant 0 : index
    %75 = vector.load %arg9[%c0_26, %c0_27] : memref<8x32xf32, #tpu.memory_space<vmem>>, vector<8x8xf32>
    tpu.vector_store %arg9[%c0_26, %c0_27], %74 {strides = array<i32>} : memref<8x32xf32, #tpu.memory_space<vmem>>, vector<8x8xf32>,
    %76 = vector.extract_strided_slice %28 {offsets = [0, 8], sizes = [8, 8], strides = [1, 1]} : vector<8x32xf32> to vector<8x8xf32>
    %77 = vector.extract_strided_slice %29 {offsets = [0, 8], sizes = [8, 8], strides = [1, 1]} : vector<8x32xf32> to vector<8x8xf32>
    %78 = vector.extract_strided_slice %30 {offsets = [0, 8], sizes = [8, 8], strides = [1, 1]} : vector<8x32xf32> to vector<8x8xf32>
    %cst_28 = arith.constant dense<0.000000e+00> : vector<8x8xf32>
    %79 = tpu.matmul %76, %77, %cst_28 {dimension_numbers = #tpu.dot_dimension_numbers<[1], [1], [0], [0], [0, 0, 1, 0], [], []>} : vector<8x8xf32>, vector<8x8xf32>, vector<8x8xf32> -> vector<8x8xf32>
    %80 = arith.mulf %76, %76 : vector<8x8xf32>
    %cst_29 = arith.constant dense<0.000000e+00> : vector<8xf32>
    %81 = vector.multi_reduction <add>, %80, %cst_29 [1] : vector<8x8xf32> to vector<8xf32>
    %82 = vector.shape_cast %81 : vector<8xf32> to vector<8x1xf32>
    %cst_30 = arith.constant 1.000000e-16 : f32
    %83 = vector.broadcast %cst_30 : f32 to vector<8x1xf32>
    %84 = arith.maximumf %82, %83 : vector<8x1xf32>
    %85 = math.rsqrt %84 : vector<8x1xf32>
    %86 = arith.mulf %77, %77 : vector<8x8xf32>
    %cst_31 = arith.constant dense<0.000000e+00> : vector<8xf32>
    %87 = vector.multi_reduction <add>, %86, %cst_31 [1] : vector<8x8xf32> to vector<8xf32>
    %88 = vector.shape_cast %87 : vector<8xf32> to vector<8x1xf32>
    %cst_32 = arith.constant 1.000000e-16 : f32
    %89 = vector.broadcast %cst_32 : f32 to vector<8x1xf32>
    %90 = arith.maximumf %88, %89 : vector<8x1xf32>
    %91 = math.rsqrt %90 : vector<8x1xf32>
    %92 = vector.broadcast %85 : vector<8x1xf32> to vector<8x8xf32>
    %93 = arith.mulf %79, %92 : vector<8x8xf32>
    %94 = tpu.transpose %91, [1, 0] : vector<8x1xf32> -> vector<1x8xf32>
    %95 = vector.broadcast %94 : vector<1x8xf32> to vector<8x8xf32>
    %96 = arith.mulf %93, %95 : vector<8x8xf32>
    %cst_33 = arith.constant dense<0.000000e+00> : vector<8xf32>
    %97 = vector.multi_reduction <add>, %76, %cst_33 [1] : vector<8x8xf32> to vector<8xf32>
    %98 = vector.shape_cast %97 : vector<8xf32> to vector<8x1xf32>
    %cst_34 = arith.constant 8.000000e+00 : f32
    %99 = vector.broadcast %cst_34 : f32 to vector<8x1xf32>
    %100 = arith.divf %98, %99 : vector<8x1xf32>
    %cst_35 = arith.constant dense<0.000000e+00> : vector<8xf32>
    %101 = vector.multi_reduction <add>, %77, %cst_35 [1] : vector<8x8xf32> to vector<8xf32>
    %102 = vector.shape_cast %101 : vector<8xf32> to vector<8x1xf32>
    %cst_36 = arith.constant 8.000000e+00 : f32
    %103 = vector.broadcast %cst_36 : f32 to vector<8x1xf32>
    %104 = arith.divf %102, %103 : vector<8x1xf32>
    %cst_37 = arith.constant 1.250000e-01 : f32
    %105 = vector.broadcast %cst_37 : f32 to vector<8x8xf32>
    %106 = arith.mulf %79, %105 : vector<8x8xf32>
    %107 = tpu.transpose %104, [1, 0] : vector<8x1xf32> -> vector<1x8xf32>
    %108 = vector.broadcast %100 : vector<8x1xf32> to vector<8x8xf32>
    %109 = vector.broadcast %107 : vector<1x8xf32> to vector<8x8xf32>
    %110 = arith.mulf %108, %109 : vector<8x8xf32>
    %111 = arith.subf %106, %110 : vector<8x8xf32>
    %112 = vector.broadcast %32 : f32 to vector<8x8xf32>
    %113 = arith.mulf %112, %96 : vector<8x8xf32>
    %114 = vector.broadcast %31 : f32 to vector<8x8xf32>
    %115 = arith.mulf %114, %111 : vector<8x8xf32>
    %116 = arith.addf %113, %115 : vector<8x8xf32>
    %cst_38 = arith.constant dense<0.000000e+00> : vector<8x8xf32>
    %117 = tpu.matmul %116, %78, %cst_38 {dimension_numbers = #tpu.dot_dimension_numbers<[1], [0], [0], [1], [0, 0, 1, 1], [], []>} : vector<8x8xf32>, vector<8x8xf32>, vector<8x8xf32> -> vector<8x8xf32>
    %c0_39 = arith.constant 0 : index
    %c8 = arith.constant 8 : index
    %118 = vector.load %arg9[%c0_39, %c8] : memref<8x32xf32, #tpu.memory_space<vmem>>, vector<8x8xf32>
    tpu.vector_store %arg9[%c0_39, %c8], %117 {strides = array<i32>} : memref<8x32xf32, #tpu.memory_space<vmem>>, vector<8x8xf32>,
    %119 = vector.extract_strided_slice %28 {offsets = [0, 16], sizes = [8, 8], strides = [1, 1]} : vector<8x32xf32> to vector<8x8xf32>
    %120 = vector.extract_strided_slice %29 {offsets = [0, 16], sizes = [8, 8], strides = [1, 1]} : vector<8x32xf32> to vector<8x8xf32>
    %121 = vector.extract_strided_slice %30 {offsets = [0, 16], sizes = [8, 8], strides = [1, 1]} : vector<8x32xf32> to vector<8x8xf32>
    %cst_40 = arith.constant dense<0.000000e+00> : vector<8x8xf32>
    %122 = tpu.matmul %119, %120, %cst_40 {dimension_numbers = #tpu.dot_dimension_numbers<[1], [1], [0], [0], [0, 0, 1, 0], [], []>} : vector<8x8xf32>, vector<8x8xf32>, vector<8x8xf32> -> vector<8x8xf32>
    %123 = arith.mulf %119, %119 : vector<8x8xf32>
    %cst_41 = arith.constant dense<0.000000e+00> : vector<8xf32>
    %124 = vector.multi_reduction <add>, %123, %cst_41 [1] : vector<8x8xf32> to vector<8xf32>
    %125 = vector.shape_cast %124 : vector<8xf32> to vector<8x1xf32>
    %cst_42 = arith.constant 1.000000e-16 : f32
    %126 = vector.broadcast %cst_42 : f32 to vector<8x1xf32>
    %127 = arith.maximumf %125, %126 : vector<8x1xf32>
    %128 = math.rsqrt %127 : vector<8x1xf32>
    %129 = arith.mulf %120, %120 : vector<8x8xf32>
    %cst_43 = arith.constant dense<0.000000e+00> : vector<8xf32>
    %130 = vector.multi_reduction <add>, %129, %cst_43 [1] : vector<8x8xf32> to vector<8xf32>
    %131 = vector.shape_cast %130 : vector<8xf32> to vector<8x1xf32>
    %cst_44 = arith.constant 1.000000e-16 : f32
    %132 = vector.broadcast %cst_44 : f32 to vector<8x1xf32>
    %133 = arith.maximumf %131, %132 : vector<8x1xf32>
    %134 = math.rsqrt %133 : vector<8x1xf32>
    %135 = vector.broadcast %128 : vector<8x1xf32> to vector<8x8xf32>
    %136 = arith.mulf %122, %135 : vector<8x8xf32>
    %137 = tpu.transpose %134, [1, 0] : vector<8x1xf32> -> vector<1x8xf32>
    %138 = vector.broadcast %137 : vector<1x8xf32> to vector<8x8xf32>
    %139 = arith.mulf %136, %138 : vector<8x8xf32>
    %cst_45 = arith.constant dense<0.000000e+00> : vector<8xf32>
    %140 = vector.multi_reduction <add>, %119, %cst_45 [1] : vector<8x8xf32> to vector<8xf32>
    %141 = vector.shape_cast %140 : vector<8xf32> to vector<8x1xf32>
    %cst_46 = arith.constant 8.000000e+00 : f32
    %142 = vector.broadcast %cst_46 : f32 to vector<8x1xf32>
    %143 = arith.divf %141, %142 : vector<8x1xf32>
    %cst_47 = arith.constant dense<0.000000e+00> : vector<8xf32>
    %144 = vector.multi_reduction <add>, %120, %cst_47 [1] : vector<8x8xf32> to vector<8xf32>
    %145 = vector.shape_cast %144 : vector<8xf32> to vector<8x1xf32>
    %cst_48 = arith.constant 8.000000e+00 : f32
    %146 = vector.broadcast %cst_48 : f32 to vector<8x1xf32>
    %147 = arith.divf %145, %146 : vector<8x1xf32>
    %cst_49 = arith.constant 1.250000e-01 : f32
    %148 = vector.broadcast %cst_49 : f32 to vector<8x8xf32>
    %149 = arith.mulf %122, %148 : vector<8x8xf32>
    %150 = tpu.transpose %147, [1, 0] : vector<8x1xf32> -> vector<1x8xf32>
    %151 = vector.broadcast %143 : vector<8x1xf32> to vector<8x8xf32>
    %152 = vector.broadcast %150 : vector<1x8xf32> to vector<8x8xf32>
    %153 = arith.mulf %151, %152 : vector<8x8xf32>
    %154 = arith.subf %149, %153 : vector<8x8xf32>
    %155 = vector.broadcast %32 : f32 to vector<8x8xf32>
    %156 = arith.mulf %155, %139 : vector<8x8xf32>
    %157 = vector.broadcast %31 : f32 to vector<8x8xf32>
    %158 = arith.mulf %157, %154 : vector<8x8xf32>
    %159 = arith.addf %156, %158 : vector<8x8xf32>
    %cst_50 = arith.constant dense<0.000000e+00> : vector<8x8xf32>
    %160 = tpu.matmul %159, %121, %cst_50 {dimension_numbers = #tpu.dot_dimension_numbers<[1], [0], [0], [1], [0, 0, 1, 1], [], []>} : vector<8x8xf32>, vector<8x8xf32>, vector<8x8xf32> -> vector<8x8xf32>
    %c0_51 = arith.constant 0 : index
    %c16 = arith.constant 16 : index
    %161 = vector.load %arg9[%c0_51, %c16] : memref<8x32xf32, #tpu.memory_space<vmem>>, vector<8x8xf32>
    tpu.vector_store %arg9[%c0_51, %c16], %160 {strides = array<i32>} : memref<8x32xf32, #tpu.memory_space<vmem>>, vector<8x8xf32>,
    %162 = vector.extract_strided_slice %28 {offsets = [0, 24], sizes = [8, 8], strides = [1, 1]} : vector<8x32xf32> to vector<8x8xf32>
    %163 = vector.extract_strided_slice %29 {offsets = [0, 24], sizes = [8, 8], strides = [1, 1]} : vector<8x32xf32> to vector<8x8xf32>
    %164 = vector.extract_strided_slice %30 {offsets = [0, 24], sizes = [8, 8], strides = [1, 1]} : vector<8x32xf32> to vector<8x8xf32>
    %cst_52 = arith.constant dense<0.000000e+00> : vector<8x8xf32>
    %165 = tpu.matmul %162, %163, %cst_52 {dimension_numbers = #tpu.dot_dimension_numbers<[1], [1], [0], [0], [0, 0, 1, 0], [], []>} : vector<8x8xf32>, vector<8x8xf32>, vector<8x8xf32> -> vector<8x8xf32>
    %166 = arith.mulf %162, %162 : vector<8x8xf32>
    %cst_53 = arith.constant dense<0.000000e+00> : vector<8xf32>
    %167 = vector.multi_reduction <add>, %166, %cst_53 [1] : vector<8x8xf32> to vector<8xf32>
    %168 = vector.shape_cast %167 : vector<8xf32> to vector<8x1xf32>
    %cst_54 = arith.constant 1.000000e-16 : f32
    %169 = vector.broadcast %cst_54 : f32 to vector<8x1xf32>
    %170 = arith.maximumf %168, %169 : vector<8x1xf32>
    %171 = math.rsqrt %170 : vector<8x1xf32>
    %172 = arith.mulf %163, %163 : vector<8x8xf32>
    %cst_55 = arith.constant dense<0.000000e+00> : vector<8xf32>
    %173 = vector.multi_reduction <add>, %172, %cst_55 [1] : vector<8x8xf32> to vector<8xf32>
    %174 = vector.shape_cast %173 : vector<8xf32> to vector<8x1xf32>
    %cst_56 = arith.constant 1.000000e-16 : f32
    %175 = vector.broadcast %cst_56 : f32 to vector<8x1xf32>
    %176 = arith.maximumf %174, %175 : vector<8x1xf32>
    %177 = math.rsqrt %176 : vector<8x1xf32>
    %178 = vector.broadcast %171 : vector<8x1xf32> to vector<8x8xf32>
    %179 = arith.mulf %165, %178 : vector<8x8xf32>
    %180 = tpu.transpose %177, [1, 0] : vector<8x1xf32> -> vector<1x8xf32>
    %181 = vector.broadcast %180 : vector<1x8xf32> to vector<8x8xf32>
    %182 = arith.mulf %179, %181 : vector<8x8xf32>
    %cst_57 = arith.constant dense<0.000000e+00> : vector<8xf32>
    %183 = vector.multi_reduction <add>, %162, %cst_57 [1] : vector<8x8xf32> to vector<8xf32>
    %184 = vector.shape_cast %183 : vector<8xf32> to vector<8x1xf32>
    %cst_58 = arith.constant 8.000000e+00 : f32
    %185 = vector.broadcast %cst_58 : f32 to vector<8x1xf32>
    %186 = arith.divf %184, %185 : vector<8x1xf32>
    %cst_59 = arith.constant dense<0.000000e+00> : vector<8xf32>
    %187 = vector.multi_reduction <add>, %163, %cst_59 [1] : vector<8x8xf32> to vector<8xf32>
    %188 = vector.shape_cast %187 : vector<8xf32> to vector<8x1xf32>
    %cst_60 = arith.constant 8.000000e+00 : f32
    %189 = vector.broadcast %cst_60 : f32 to vector<8x1xf32>
    %190 = arith.divf %188, %189 : vector<8x1xf32>
    %cst_61 = arith.constant 1.250000e-01 : f32
    %191 = vector.broadcast %cst_61 : f32 to vector<8x8xf32>
    %192 = arith.mulf %165, %191 : vector<8x8xf32>
    %193 = tpu.transpose %190, [1, 0] : vector<8x1xf32> -> vector<1x8xf32>
    %194 = vector.broadcast %186 : vector<8x1xf32> to vector<8x8xf32>
    %195 = vector.broadcast %193 : vector<1x8xf32> to vector<8x8xf32>
    %196 = arith.mulf %194, %195 : vector<8x8xf32>
    %197 = arith.subf %192, %196 : vector<8x8xf32>
    %198 = vector.broadcast %32 : f32 to vector<8x8xf32>
    %199 = arith.mulf %198, %182 : vector<8x8xf32>
    %200 = vector.broadcast %31 : f32 to vector<8x8xf32>
    %201 = arith.mulf %200, %197 : vector<8x8xf32>
    %202 = arith.addf %199, %201 : vector<8x8xf32>
    %cst_62 = arith.constant dense<0.000000e+00> : vector<8x8xf32>
    %203 = tpu.matmul %202, %164, %cst_62 {dimension_numbers = #tpu.dot_dimension_numbers<[1], [0], [0], [1], [0, 0, 1, 1], [], []>} : vector<8x8xf32>, vector<8x8xf32>, vector<8x8xf32> -> vector<8x8xf32>
    %c0_63 = arith.constant 0 : index
    %c24 = arith.constant 24 : index
    %204 = vector.load %arg9[%c0_63, %c24] : memref<8x32xf32, #tpu.memory_space<vmem>>, vector<8x8xf32>
    tpu.vector_store %arg9[%c0_63, %c24], %203 {strides = array<i32>} : memref<8x32xf32, #tpu.memory_space<vmem>>, vector<8x8xf32>,
    %c0_64 = arith.constant 0 : index
    %c0_65 = arith.constant 0 : index
    %205 = vector.load %arg9[%c0_64, %c0_65] : memref<8x32xf32, #tpu.memory_space<vmem>>, vector<8x32xf32>
    %c0_66 = arith.constant 0 : index
    %c0_67 = arith.constant 0 : index
    %206 = vector.load %arg5[%c0_66, %c0_67] : memref<32x32xf32, #tpu.memory_space<vmem>>, vector<32x32xf32>
    %cst_68 = arith.constant dense<0.000000e+00> : vector<8x32xf32>
    %207 = tpu.matmul %205, %206, %cst_68 {dimension_numbers = #tpu.dot_dimension_numbers<[1], [0], [0], [1], [0, 0, 1, 1], [], []>} : vector<8x32xf32>, vector<32x32xf32>, vector<8x32xf32> -> vector<8x32xf32>
    %c0_69 = arith.constant 0 : index
    %c0_70 = arith.constant 0 : index
    %208 = vector.load %arg6[%c0_69, %c0_70] : memref<1x32xf32, #tpu.memory_space<vmem>>, vector<1x32xf32>
    %209 = vector.broadcast %208 : vector<1x32xf32> to vector<8x32xf32>
    %210 = arith.addf %207, %209 : vector<8x32xf32>
    %c0_71 = arith.constant 0 : index
    %c0_72 = arith.constant 0 : index
    %c0_73 = arith.constant 0 : index
    %211 = vector.load %arg8[%c0_71, %c0_72, %c0_73] : memref<1x8x32xf32, #tpu.memory_space<vmem>>, vector<1x8x32xf32>
    %212 = vector.shape_cast %211 : vector<1x8x32xf32> to vector<8x32xf32>
    %213 = vector.shape_cast %210 : vector<8x32xf32> to vector<1x8x32xf32>
    tpu.vector_store %arg8[%c0_71, %c0_72, %c0_73], %213 {strides = array<i32>} : memref<1x8x32xf32, #tpu.memory_space<vmem>>, vector<1x8x32xf32>,
    return
  }
  func.func @transform_0(%arg0: i32) -> i32 {
    %c0_i32 = arith.constant 0 : i32
    %c0_i32_0 = arith.constant 0 : i32
    return %c0_i32 : i32
  }
  func.func @transform_1(%arg0: i32) -> (i32, i32) {
    %c0_i32 = arith.constant 0 : i32
    %c0_i32_0 = arith.constant 0 : i32
    %c0_i32_1 = arith.constant 0 : i32
    return %c0_i32, %c0_i32_0 : i32, i32
  }
  func.func @transform_2(%arg0: i32) -> (i32, i32) {
    %c0_i32 = arith.constant 0 : i32
    %c0_i32_0 = arith.constant 0 : i32
    %c0_i32_1 = arith.constant 0 : i32
    return %c0_i32, %c0_i32_0 : i32, i32
  }
  func.func @transform_3(%arg0: i32) -> (i32, i32) {
    %c0_i32 = arith.constant 0 : i32
    %c0_i32_0 = arith.constant 0 : i32
    %c0_i32_1 = arith.constant 0 : i32
    return %c0_i32, %c0_i32_0 : i32, i32
  }
  func.func @transform_4(%arg0: i32) -> (i32, i32) {
    %c0_i32 = arith.constant 0 : i32
    %c0_i32_0 = arith.constant 0 : i32
    %c0_i32_1 = arith.constant 0 : i32
    return %c0_i32, %c0_i32_0 : i32, i32
  }
  func.func @transform_5(%arg0: i32) -> (i32, i32) {
    %c0_i32 = arith.constant 0 : i32
    %c0_i32_0 = arith.constant 0 : i32
    %c0_i32_1 = arith.constant 0 : i32
    return %c0_i32, %c0_i32_0 : i32, i32
  }
  func.func @transform_6(%arg0: i32) -> (i32, i32, i32) {
    %c0_i32 = arith.constant 0 : i32
    %c0_i32_0 = arith.constant 0 : i32
    %c0_i32_1 = arith.constant 0 : i32
    return %arg0, %c0_i32, %c0_i32_0 : i32, i32, i32
  }
  func.func @transform_7(%arg0: i32) -> (i32, i32, i32) {
    %c0_i32 = arith.constant 0 : i32
    %c0_i32_0 = arith.constant 0 : i32
    %c0_i32_1 = arith.constant 0 : i32
    return %arg0, %c0_i32, %c0_i32_0 : i32, i32, i32
  }
}

</mosaic_0001>

<bundles_post_ra>
// kernel: tpu_custom_call.1
= control target key start
LH: loop header
LB: loop body
LE: loop exit
PB: predicated region body
PF: predicated region fallthrough
CT: control target
= control target key end

     0   :  { %s2589_s0 = inlined_call_operand.<no memory space> [shape: f32[1], index: 0, kind: input, shape index: {}]   ;;  %s2590_s1 = inlined_call_operand.vmem [shape: f32[1,32], index: 1, kind: input, shape index: {}]   ;;  %s2591_s2 = inlined_call_operand.vmem [shape: f32[1,32], index: 2, kind: input, shape index: {}]   ;;  %s2592_s3 = inlined_call_operand.hbm [shape: f32[32,32], index: 3, kind: input, shape index: {}]   ;;  %s2593_s4 = inlined_call_operand.hbm [shape: f32[32,32], index: 4, kind: input, shape index: {}]   ;;  %s2594_s5 = inlined_call_operand.vmem [shape: f32[1,32], index: 5, kind: input, shape index: {}]   ;;  %s2595_s6 = inlined_call_operand.hbm [shape: f32[2,24,32], index: 6, kind: input, shape index: {}]   ;;  %s2596_s7 = inlined_call_operand.hbm [shape: f32[2,8,32], index: 7, kind: output, shape index: {}]  }
   0x1   :  { %12 = sst [smem:[#allocation3]] %s2589_s0 }
   0x2   :  { %13 = vsyncpa [#allocation5], 0 }
   0x3   :  { %14 = vsyncpa [#allocation8], 0 }
   0x4   :  { %15 = vsyncpa [#allocation6], 0 }
   0x5   :  { %17 = vsyncpa [#allocation6 + $0x1], 0  ;;  %s2192_s26 = smov 0   ;;  %s2194_s27 = smov 0  }
   0x6   :  { %s2196_s28 = smov 0   ;;  %s2198_s29 = smov 0  }
   0x7 LB: > { %s2213_s0 = sadd.s32 4294967295, %s2132_s29   ;;  %s1728_s30 = sadd.s32 4294967294, %s2132_s29   ;;  %s2132_s29 = sphi %s2198_s29, %s2628_s29   ;;  %s2128_s28 = sphi %s2196_s28, %s2627_s28   ;;  %s2124_s27 = sphi %s2194_s27, %s2626_s27   ;;  %s2120_s26 = sphi %s2192_s26, %s2625_s26  }
   0x8   : > { %s2217_s8 = sadd.s32 1, %s2132_s29   ;;  %s156_s9 = sadd.s32 1, %s2128_s28 }
   0x9   : > { %s153_s10 = ssub.s32 %s2132_s29, %s2217_s8  ;;  %p163_p0 = scmp.ne.s32.totalorder %s2128_s28, %s2124_s27 }
   0xa   : > { %p154_p1 = scmp.eq.s32.totalorder %s153_s10, 0  ;;  %p164_p2 = scmp.eq.s32.totalorder %s2132_s29, 0 }
   0xb   : > { %p169_p3 = scmp.ne.s32.totalorder %s2124_s27, %s2120_s26  ;;  %p2597_p4 = scmp.eq.s32.totalorder %s2213_s0, 0 }
   0xc   : > { %s2229_s11 = scalar_select %p154_p1, %s2128_s28, %s156_s9  }
   0xd   : > { %p2231_p5 = por %p164_p2, %p163_p0  ;;  %p2237_p6 = por %p2597_p4, %p169_p3 }
   0xe   : > { %2603 = sst [smem:[#allocation15_spill]] %s2229_s11  ;;  %p193_p7 = scmp.eq.s32.totalorder %s2213_s0, 1 }
   0xf   : > { %s2604_s12 = scalar_select %p2231_p5, 1, 0 }
  0x10   : > { %s2605_s13 = scalar_select %p2237_p6, 1, 0 }
  0x11   : > { %p199_p8 = scmp.eq.s32.totalorder %s1728_s30, 1  ;;  %p1729_p9 = scmp.ge.s32.totalorder %s2132_s29, 1 }
  0x12   : > { %p206_p10 = scmp.lt.s32.totalorder %s2132_s29, 3  ;;  %p2244_p11 = por %p193_p7, %p163_p0 }
  0x13   : > { %p2248_p12 = por %p199_p8, %p169_p3  ;;  %s2134_s17 = smov [#allocation4]  }
  0x14   : > { %s2606_s14 = scalar_select %p2244_p11, 1, 0 }
  0x15   : > { %s2607_s15 = scalar_select %p2248_p12, 1, 0 }
  0x16   : > { %p2252_p13 = pnand %p1729_p9, %p206_p10  ;;  %s227_s18 = sshll.u32 %s2134_s17, 4  ;;  %s228_s18 = int_to_ptr.vmem [resolvable:$true] %s227_s18 }
  0x17   : > { %s2135_s20 = smov [#allocation7]   ;;  %s1972_s24 = scalar_lea.hbm %s2592_s3, 512 }
  0x18   : > { %s2608_s16 = scalar_select %p2252_p13, 1, 0 }
  0x19   : > { %p1884_p1 = pneg %p2252_p13  ;;  %s240_s21 = sshll.u32 %s2135_s20, 4  ;;  %s241_s21 = int_to_ptr.vmem [resolvable:$true] %s240_s21 }
  0x1a   : > { %p1973_p7 = scmp.ne.s32.totalorder %s2592_s3, %s1972_s24 }
  0x1b   : > { %p2260_p2 = pnand %p1884_p1, %p2597_p4  ;;  %p1979_p1 = scmp.lt.u32.totalorder %s1972_s24, %s2592_s3 }
  0x1d   : > { %p1974_p8 = pneg %p2260_p2 }
  0x1f   : > { %p1975_p9 = pnand %p1974_p8, %p1973_p7 }
  0x21   : > { %p1976_p10 = pneg %p1975_p9 }
  0x23   : > { %p1981_p0 = pnand %p1979_p1, %p1976_p10 }
  0x25   : > { %1984 = shalt.err (!%p1981_p0)
}
  0x26   : > { %s1985_s17 = scalar_lea.vmem %s228_s18, 512  ;;  %p1993_p11 = scmp.lt.s32.totalorder %s228_s18, %s228_s18 }
  0x27   : > { %p1986_p4 = scmp.ne.s32.totalorder %s228_s18, %s1985_s17  ;;  %p1994_p6 = scmp.lt.s32.totalorder %s1985_s17, %s1985_s17 }
  0x29   : > { %p1988_p3 = pnand %p1986_p4, %p1974_p8  ;;  %p1995_p13 = por %p1994_p6, %p1993_p11 }
  0x2b   : > { %p1989_p12 = pneg %p1988_p3 }
  0x2d   : > { %p1996_p5 = pnand %p1995_p13, %p1989_p12 }
  0x2f   : > { %1999 = shalt.err (!%p1996_p5)
}
  0x30   : > { %s2602_s20 = smov 128   ;;  %s2137_s22 = smov 8  }
  0x31   : > { %1887 = dma.hbm_to_vmem [thread:$0]  (!%p2260_p2), %s2592_s3, 512, %s228_s18, [#allocation5], %s2602_s20, %s2602_s20, %s2137_s22  }
  0x32   : > { %p2610_p4 = scmp.ne.s32.totalorder %s2604_s12, 0  ;;  %p2611_p0 = scmp.lt.s32.totalorder %s2132_s29, 2 }
  0x33   : > { %s2000_s10 = scalar_lea.hbm %s2593_s4, 512 }
  0x34   : > { %p2295_p3 = pnand %p2611_p0, %p2610_p4  ;;  %p2001_p5 = scmp.ne.s32.totalorder %s2593_s4, %s2000_s10 }
  0x35   : > { %p2007_p12 = scmp.lt.u32.totalorder %s2000_s10, %s2593_s4 }
  0x36   : > { %s2612_s25 = scalar_select %p2295_p3, 1, 0 }
  0x37   : > { %p2003_p6 = pnand %p2001_p5, %p1974_p8 }
  0x39   : > { %p2004_p11 = pneg %p2003_p6 }
  0x3b   : > { %p2009_p13 = pnand %p2007_p12, %p2004_p11 }
  0x3d   : > { %2012 = shalt.err (!%p2009_p13)
}
  0x3e   : > { %s2013_s23 = scalar_lea.vmem %s241_s21, 512  ;;  %p2021_p1 = scmp.lt.s32.totalorder %s241_s21, %s241_s21 }
  0x3f   : > { %p2014_p7 = scmp.ne.s32.totalorder %s241_s21, %s2013_s23  ;;  %p2022_p4 = scmp.lt.s32.totalorder %s2013_s23, %s2013_s23 }
  0x41   : > { %p2016_p9 = pnand %p2014_p7, %p1974_p8  ;;  %p2023_p0 = por %p2022_p4, %p2021_p1 }
  0x43   : > { %p2017_p10 = pneg %p2016_p9 }
  0x45   : > { %p2024_p3 = pnand %p2023_p0, %p2017_p10 }
  0x47   : > { %2027 = shalt.err (!%p2024_p3)
}
  0x48   : > { %1890 = dma.hbm_to_vmem [thread:$0]  (!%p2260_p2), %s2593_s4, 512, %s241_s21, [#allocation8], %s2602_s20, %s2602_s20, %s2137_s22  }
  0x49   : > { %s257_s30 = sand.u32 1, %s2132_s29   ;;  %s259_s9 = sand.u32 1, %s2128_s28  }
  0x4a   : > { %s1869_s10 = smul.u32 24, %s259_s9  ;;  %s2332_s24 = scalar_lea.sflag [#allocation5], %s257_s30 }
  0x4b   : > { %s1870_s17 = smul.u32 384, %s2132_s29  ;;  %p2613_p8 = scmp.ne.s32.totalorder %s2612_s25, 0 }
  0x4c   : > { %s261_s23 = scalar_lea.vmem [#allocation9], %s1869_s10  ;;  %s2033_s18 = scalar_lea.hbm %s2595_s6, 768 }
  0x4d   : > { %s2328_s19 = scalar_lea.hbm %s2595_s6, %s1870_s17  ;;  %s268_s11 = sshll.u32 %s261_s23, 4  ;;  %s2330_s11 = int_to_ptr.vmem [resolvable:$true] %s268_s11 }
  0x4e   : > { %s2028_s21 = scalar_lea.hbm %s2328_s19, 384  ;;  %p2030_p3 = pneg %p2613_p8 }
  0x4f   : > { %p2029_p2 = scmp.ne.s32.totalorder %s2328_s19, %s2028_s21  ;;  %p2034_p11 = scmp.lt.u32.totalorder %s2328_s19, %s2595_s6 }
  0x50   : > { %p2035_p12 = scmp.lt.u32.totalorder %s2033_s18, %s2028_s21  ;;  %p2037_p7 = scmp.lt.u32.totalorder %s2028_s21, %s2328_s19 }
  0x51   : > { %p2031_p5 = pnand %p2030_p3, %p2029_p2 }
  0x52   : > { %p2036_p13 = por %p2035_p12, %p2034_p11 }
  0x53   : > { %p2032_p6 = pneg %p2031_p5 }
  0x54   : > { %p2038_p9 = por %p2037_p7, %p2036_p13 }
  0x56   : > { %p2039_p10 = pnand %p2038_p9, %p2032_p6 }
  0x58   : > { %2042 = shalt.err (!%p2039_p10)
}
  0x59   : > { %s2043_s30 = scalar_lea.vmem %s2330_s11, 384  ;;  %s2138_s10 = smov [#allocation9]  }
  0x5a   : > { %p2044_p1 = scmp.ne.s32.totalorder %s2330_s11, %s2043_s30  ;;  %s2048_s23 = sshll.u32 %s2138_s10, 4  ;;  %s2049_s23 = int_to_ptr.vmem [resolvable:$false] %s2048_s23 }
  0x5b   : > { %s2050_s20 = scalar_lea.vmem %s2049_s23, 768  ;;  %p2051_p2 = scmp.lt.s32.totalorder %s2330_s11, %s2049_s23 }
  0x5c   : > { %p2046_p4 = pnand %p2044_p1, %p2030_p3  ;;  %p2052_p5 = scmp.lt.s32.totalorder %s2050_s20, %s2043_s30 }
  0x5e   : > { %p2047_p0 = pneg %p2046_p4  ;;  %p2053_p11 = por %p2052_p5, %p2051_p2 }
  0x60   : > { %p2054_p12 = pnand %p2053_p11, %p2047_p0 }
  0x62   : > { %2057 = shalt.err (!%p2054_p12)
}
  0x63   : > { %s2614_s21 = smov 128   ;;  %p2615_p3 = scmp.ne.s32.totalorder %s2608_s16, 0 }
  0x64   : > { %1894 = dma.hbm_to_vmem [thread:$0]  (!%p2613_p8), %s2328_s19, 384, %s2330_s11, %s2332_s24, %s2614_s21, %s2614_s21, %s2137_s22  }
  0x65   : > { %280 = sbr.rel (%p2615_p3) target bundleno = 2135 (0x857), region = 48  ;;  %p2616_p6 = scmp.eq.s32.totalorder (!%p2615_p3), %s2213_s0, 0 }
  0x6c   : > { %2103 = dma.done.wait (%p2616_p6), [#allocation5], 512   ;;  %p2617_p13 = pmov %p2616_p6 }
  0x6d   : > { %p2618_p7 = pmov %p2616_p6 }
  0x6e   : > { %2105 = vsyncadd (%p2617_p13), [#allocation5], 4294966784 }
  0x6f   : > { %2107 = dma.done.wait (%p2618_p7), [#allocation8], 512   ;;  %p2619_p9 = pmov %p2616_p6 }
  0x70   : > { %s290_s25 = sand.u32 1, %s2213_s0   ;;  %s2375_s22 = sand.u32 1, %s2124_s27  }
  0x71   : > { %2109 = vsyncadd (%p2619_p9), [#allocation8], 4294966784  ;;  %s1871_s16 = smul.u32 24, %s2375_s22  ;;  %s291_s19 = scalar_lea.sflag [#allocation5], %s290_s25 }
  0x72   : > { %p2620_p8 = scmp.ne.s32.totalorder %s2605_s13, 0 }
  0x73   : > { %s294_s11 = scalar_lea.vmem [#allocation9], %s1871_s16 }
  0x74   : > { %2111 = dma.done.wait (%p2620_p8), %s291_s19, 384  }
  0x75   : > { %2113 = vsyncadd (%p2620_p8), %s291_s19, 4294966912  ;;  %vm330_vm0 = vcmask 261120   ;;  %v327_v0 = vld [vmem:[%s294_s11] sm:$0xff]  ;;  %v328_v1 = vld [vmem:[%s294_s11 + $0x8] sm:$0xff]  ;;  %v2139_v19 = vmov 0.0|0.0   ;;  %vm2140_vm1 = vmmov 0  }
  0x76   : > { %v331_v2 = vsel %vm330_vm0, %v327_v0, 0.0  ;;  %v334_v3 = vsel %vm330_vm0, %v328_v1, 0.0  ;;  %v329_v4 = vld [vmem:[%s294_s11 + $0x10] sm:$0xff]  ;;  %v389_v16 = vld [vmem:[#allocation4] sm:$0xff]  ;;  %1857 = vmatprep.subr.bf16.mxu0 %v2139_v19  ;;  %v392_v21 = vld [vmem:[#allocation4 + $0x18] sm:$0xff]  ;;  %v2141_v22 = vmov 0.0  }
  0x77   : > { %332 = vadd.xlane.f32.xlu0 %v331_v2  ;;  %v337_v5 = vsel %vm330_vm0, %v329_v4, 0.0  ;;  %v390_v17 = vld [vmem:[#allocation4 + $0x8] sm:$0xff]  ;;  %v391_v18 = vld [vmem:[#allocation4 + $0x10] sm:$0xff]  ;;  %1797 = vmatprep.mubr.msk.f32.mxu0 %vm2140_vm1, %v2141_v22  ;;  %v1738_v36 = vld [vmem:[%s2590_s1] ss:$0 sm:$0xff]  ;;  %vm484_vm2 = vcmask 64512  }
  0x78   : > { %v1858_v20 = vpack.c.bf16 %v390_v17, %v389_v16  ;;  %1806 = vmatprep.subr.mxu1 %v2141_v22  ;;  %1808 = vmatprep.mubr.msk.f32.mxu1 %vm2140_vm1, %v2141_v22  ;;  %v1861_v23 = vpack.c.bf16 %v392_v21, %v391_v18  ;;  %v1739_v38 = vld [vmem:[%s2591_s2] ss:$0 sm:$0xff]  ;;  %s2142_s18 = smov 120   ;;  %s482_s12 = sld [smem:[#allocation3]]  ;;  %vm1005_vm3 = vcmask 130112   ;;  %vm1271_vm4 = vcmask 195712  }
  0x79   : > { %s2143_s10 = smov 104   ;;  %s2144_s23 = smov 112   ;;  %vm1537_vm5 = vcmask 261312  }
  0x7a   : > { %1859 = vmatpush3.bf16.msra.mxu0 %v1858_v20  ;;  %s2145_s20 = smov 8   ;;  %s2146_s21 = smov 16  }
  0x7b   : > { %335 = vadd.xlane.f32.xlu0 %v334_v3  ;;  %1860 = vmatprep.subr.bf16.mxu0 %v2139_v19  ;;  %s2147_s25 = smov 24   ;;  %s1737_s16 = sshll.u32 %s2375_s22, 3 }
  0x7c   : > { %s1758_s13 = sshll.u32 %s2213_s0, 7  ;;  %s324_s24 = scalar_lea.vmem [#allocation10], %s1737_s16 }
  0x7d   : > { %s1639_s9 = sshll.u32 %s324_s24, 4  ;;  %p2621_p1 = scmp.ne.s32.totalorder %s2606_s14, 0  ;;  %s2546_s9 = int_to_ptr.vmem [resolvable:$true] %s1639_s9 }
  0x7e   : > { %1862 = vmatpush3.bf16.msra.mxu0 %v1861_v23  ;;  %s483_s30 = ssub.f32 1.0, %s482_s12  ;;  %s2148_s0 = smov [#allocation10]  }
  0x7f   : > { %338 = vadd.xlane.f32.xlu0 %v337_v5  ;;  %1836 = vmatprep.subr.mxu0 %v2141_v22 }
 0x104   : > { %v333_v6 = vpop.xlane.xlu0 %332 }
 0x105   : > { %v341_v7 = vmul.f32 0.03125, %v333_v6 }
 0x107   : > { %v344_v8 = vsub.f32 %v327_v0, %v341_v7 }
 0x108   : > { %v336_v9 = vpop.xlane.xlu0 %335 }
 0x109   : > { %v342_v10 = vmul.f32 0.03125, %v336_v9  ;;  %v347_v11 = vmul.f32 %v344_v8, %v344_v8 }
 0x10b   : > { %v345_v12 = vsub.f32 %v328_v1, %v342_v10  ;;  %v350_v13 = vsel %vm330_vm0, %v347_v11, 0.0  ;;  %v606_v11 = vlaneseq }
 0x10c   : > { %351 = vadd.xlane.f32.xlu1 %v350_v13  ;;  %v339_v24 = vpop.xlane.xlu0 %338 }
 0x10d   : > { %v348_v14 = vmul.f32 %v345_v12, %v345_v12  ;;  %v343_v25 = vmul.f32 0.03125, %v339_v24 }
 0x10f   : > { %v353_v15 = vsel %vm330_vm0, %v348_v14, 0.0  ;;  %v346_v26 = vsub.f32 %v329_v4, %v343_v25 }
 0x110   : > { %354 = vadd.xlane.f32.xlu1 %v353_v15 }
 0x111   : > { %v349_v27 = vmul.f32 %v346_v26, %v346_v26 }
 0x113   : > { %v356_v28 = vsel %vm330_vm0, %v349_v27, 0.0 }
 0x114   : > { %357 = vadd.xlane.f32.xlu1 %v356_v28  ;;  %v2455_v28 = vstv %s482_s12  ;;  %s2544_s12 = scalar_lea.hbm %s2596_s7, %s1758_s13 }
 0x199   : > { %v352_v29 = vpop.xlane.xlu1 %351 }
 0x19a   : > { %v359_v30 = vmul.f32 0.03125, %v352_v29  ;;  %v2457_v29 = vstv %s483_s30  ;;  %s1626_s30 = scalar_lea.sflag [#allocation6], %s2375_s22 }
 0x19c   : > { %v362_v31 = vadd.f32 1e-05, %v359_v30 }
 0x19d   : > { %v355_v32 = vpop.xlane.xlu1 %354 }
 0x19e   : > { %1950 = vrsqrt.f32 %v362_v31  ;;  %v360_v33 = vmul.f32 0.03125, %v355_v32 }
 0x1a0   : > { %v363_v34 = vadd.f32 1e-05, %v360_v33 }
 0x1a1   : > { %v358_v45 = vpop.xlane.xlu1 %357 }
 0x1a2   : > { %1952 = vrsqrt.f32 %v363_v34  ;;  %v361_v46 = vmul.f32 0.03125, %v358_v45 }
 0x1a4   : > { %v364_v47 = vadd.f32 1e-05, %v361_v46 }
 0x1a6   : > { %1954 = vrsqrt.f32 %v364_v47 }
 0x1a8   : > { %v1951_v35 = vpop.eup %1950 }
 0x1a9   : > { %v368_v37 = vmul.f32 %v1951_v35, %v344_v8 }
 0x1ab   : > { %v377_v39 = vmul.f32 %v1738_v36, %v368_v37 }
 0x1ac   : > { %v1953_v40 = vpop.eup %1952 }
 0x1ad   : > { %v386_v41 = vadd.f32 %v1739_v38, %v377_v39  ;;  %v369_v42 = vmul.f32 %v1953_v40, %v345_v12  ;;  %v607_v12 = vshrl.u32 %v606_v11, 7 }
 0x1af   : > { %1798 = vmatmul.mubr.msk.f32.vlgmr.msra.gmra.mrb[0].mxu0 %vm330_vm0, %v386_v41  ;;  %v378_v43 = vmul.f32 %v1738_v36, %v369_v42  ;;  %v2451_v15 = vsub.s32 0, %v607_v12 }
 0x1b0   : > { %1800 = vmatprep.mubr.msk.f32.mxu0 %vm2140_vm1, %v2141_v22  ;;  %v1955_v48 = vpop.eup %1954 }
 0x1b1   : > { %v387_v44 = vadd.f32 %v1739_v38, %v378_v43  ;;  %v370_v49 = vmul.f32 %v1955_v48, %v346_v26 }
 0x1b3   : > { %1801 = vmatmul.mubr.msk.f32.gmra.mrb[2].mxu0 %vm330_vm0, %v387_v44  ;;  %v379_v50 = vmul.f32 %v1738_v36, %v370_v49 }
 0x1b4   : > { %1803 = vmatprep.mubr.msk.f32.mxu0 %vm2140_vm1, %v2141_v22 }
 0x1b5   : > { %v388_v51 = vadd.f32 %v1739_v38, %v379_v50 }
 0x1b7   : > { %1804 = vmatmul.mubr.msk.f32.gmra.mrb[4].mxu0 %vm330_vm0, %v388_v51 }
 0x1b8   : > { %1838 = vmatprep.mubr.msk.f32.mxu0 %vm2140_vm1, %v2141_v22 }
 0x282   : > { %v2411_v52 = vpop.f32.mrb[0].mxu0 }
 0x283   : > { %v1799_v53 = vpop.f32.mrb[1].mxu0  ;;  %v2428_v59 = vmul.f32 %v2411_v52, %v2411_v52  ;;  %v611_v60 = vsel %vm484_vm2, %v2411_v52, 0.0 }
 0x285   : > { %v562_v61 = vsel %vm484_vm2, %v2428_v59, 0.0 }
 0x286   : > { %v2413_v54 = vpop.f32.mrb[2].mxu0 }
 0x287   : > { %v1802_v55 = vpop.f32.mrb[3].mxu0  ;;  %1807 = vmatpush3.xpose.msk.msra.mxu1 %vm484_vm2, %v2413_v54  ;;  %v616_v56 = vsel %vm484_vm2, %v2413_v54, 0.0  ;;  %v2421_v57 = vmul.f32 %v2413_v54, %v2413_v54 }
 0x288   : > { %617 = vadd.xlane.f32.xlu1 %v616_v56  ;;  %1811 = vmatprep.subr.mxu1 %v2141_v22 }
 0x289   : > { %v568_v58 = vsel %vm484_vm2, %v2421_v57, 0.0 }
 0x28a   : > { %569 = vadd.xlane.f32.xlu0 %v568_v58  ;;  %1809 = vmatmul.mubr.msk.f32.vlgmr.msra.gmra.mrb[0].mxu1 %vm484_vm2, %v2411_v52  ;;  %v2442_v2 = vpop.f32.mrb[4].mxu0 }
 0x28b   : > { %1813 = vmatprep.mubr.msk.f32.mxu1 %vm2140_vm1, %v2141_v22  ;;  %v1805_v3 = vpop.f32.mrb[5].mxu0  ;;  %1812 = vmatpush3.msra.mxu1 %v2442_v2 }
 0x28c   : > { %612 = vadd.xlane.f32.xlu1 %v611_v60  ;;  %1816 = vmatprep.subr.mxu1 %v2141_v22 }
 0x28e   : > { %563 = vadd.xlane.f32.xlu0 %v562_v61 }
 0x29d   : > { %738 = vrot.lane.b32.xlu1 %v2411_v52, %s2142_s18 }
 0x2a4   : > { %740 = vrot.lane.b32.xlu0 %v2413_v54, %s2142_s18 }
 0x315   : > { %v618_v62 = vpop.xlane.xlu1 %617 }
 0x316   : > { %v619_v63 = vmul.f32 0.125, %v618_v62 }
 0x317   : > { %v570_v0 = vpop.xlane.xlu0 %569 }
 0x318   : > { %v571_v1 = vmax.f32 %v570_v0, 1e-16  ;;  %621 = vxpose.xlu1.b32.start.end [1/1] (short) (narrow) %v619_v63, 8 }
 0x319   : > { %v613_v10 = vpop.xlane.xlu1 %612 }
 0x31a   : > { %1956 = vrsqrt.f32 %v571_v1  ;;  %v615_v18 = vmul.f32 0.125, %v613_v10 }
 0x31b   : > { %v564_v7 = vpop.xlane.xlu0 %563 }
 0x31c   : > { %v565_v13 = vmax.f32 %v564_v7, 1e-16 }
 0x31d   : > { %v739_v14 = vpop.permute.xlu1 %738 }
 0x31e   : > { %1958 = vrsqrt.f32 %v565_v13  ;;  %v873_v38 = vsel %vm484_vm2, %v739_v14, 0.0 }
 0x31f   : > { %v741_v8 = vpop.permute.xlu0 %740 }
 0x320   : > { %v878_v9 = vsel %vm484_vm2, %v741_v8, 0.0 }
 0x324   : > { %v1957_v4 = vpop.eup %1956 }
 0x325   : > { %574 = vxpose.xlu0.b32.start.end [1/1] (short) (narrow) %v1957_v4, 8 }
 0x328   : > { %v1959_v23 = vpop.eup %1958 }
 0x336   : > { %817 = vrot.lane.b32.xlu1 %v2428_v59, %s2142_s18 }
 0x34e   : > { %826 = vrot.lane.b32.xlu0 %v2421_v57, %s2142_s18 }
 0x35d   : > { %v557_v5 = vpop.f32.mrb[0].mxu1 }
 0x35e   : > { %v1810_v6 = vpop.f32.mrb[1].mxu1  ;;  %v620_v21 = vmul.f32 0.125, %v557_v5  ;;  %v573_v25 = vmul.f32 %v1959_v23, %v557_v5 }
 0x36d   : > { %879 = vadd.xlane.f32.xlu0 %v878_v9 }
 0x398   : > { %v637_v16 = vpop.trf.xlu1 }
 0x399   : > { %v656_v17 = vrot.slane %v637_v16, %v2451_v15 }
 0x39b   : > { %v657_v20 = vmul.f32 %v656_v17, %v615_v18 }
 0x39d   : > { %v658_v26 = vsub.f32 %v620_v21, %v657_v20 }
 0x39f   : > { %v662_v33 = vmul.f32 %v2455_v28, %v658_v26 }
 0x3a5   : > { %v590_v24 = vpop.trf.xlu0 }
 0x3a6   : > { %v609_v27 = vrot.slane %v590_v24, %v2451_v15 }
 0x3a8   : > { %v610_v30 = vmul.f32 %v609_v27, %v573_v25  ;;  %v818_v31 = vpop.permute.xlu1 %817 }
 0x3a9   : > { %v820_v32 = vsel %vm484_vm2, %v818_v31, 0.0 }
 0x3aa   : > { %v660_v34 = vmul.f32 %v2457_v29, %v610_v30  ;;  %821 = vadd.xlane.f32.xlu0 %v820_v32 }
 0x3ac   : > { %v663_v35 = vadd.f32 %v662_v33, %v660_v34 }
 0x3ae   : > { %1814 = vmatmul.mubr.msk.f32.vlgmr.msra.gmra.mrb[2].mxu1 %vm484_vm2, %v663_v35 }
 0x3af   : > { %1817 = vmatpush3.xpose.msk.msra.mxu1 %vm484_vm2, %v741_v8  ;;  %1818 = vmatprep.mubr.msk.f32.mxu1 %vm2140_vm1, %v2141_v22 }
 0x3b0   : > { %1821 = vmatprep.subr.mxu1 %v2141_v22 }
 0x3b2   : > { %1819 = vmatmul.mubr.msk.f32.vlgmr.msra.gmra.mrb[4].mxu1 %vm484_vm2, %v739_v14 }
 0x3b3   : > { %1823 = vmatprep.mubr.msk.f32.mxu1 %vm2140_vm1, %v2141_v22 }
 0x3c0   : > { %v827_v36 = vpop.permute.xlu0 %826  ;;  %925 = vrot.lane.b32.xlu0 %v2442_v2, %s2142_s18 }
 0x3c1   : > { %v829_v37 = vsel %vm484_vm2, %v827_v36, 0.0 }
 0x3c2   : > { %830 = vadd.xlane.f32.xlu1 %v829_v37 }
 0x3c4   : > { %1273 = vrot.lane.b32.xlu0 %v2411_v52, %s2143_s10 }
 0x3c6   : > { %874 = vadd.xlane.f32.xlu1 %v873_v38 }
 0x3d7   : > { %1009 = vrot.lane.b32.xlu1 %v2413_v54, %s2144_s23 }
 0x3db   : > { %1007 = vrot.lane.b32.xlu1 %v2411_v52, %s2144_s23 }
 0x3df   : > { %1275 = vrot.lane.b32.xlu1 %v2413_v54, %s2143_s10 }
 0x3fa   : > { %v880_v39 = vpop.xlane.xlu0 %879 }
 0x3fb   : > { %v881_v40 = vmul.f32 0.125, %v880_v39 }
 0x408   : > { %883 = vxpose.xlu1.b32.start.end [1/1] (short) (narrow) %v881_v40, 8 }
 0x426   : > { %1359 = vrot.lane.b32.xlu1 %v2421_v57, %s2143_s10 }
 0x42a   : > { %1085 = vrot.lane.b32.xlu1 %v2428_v59, %s2144_s23 }
 0x437   : > { %v822_v41 = vpop.xlane.xlu0 %821 }
 0x438   : > { %v823_v51 = vmax.f32 %v822_v41, 1e-16 }
 0x43b   : > { %v926_v42 = vpop.permute.xlu0 %925 }
 0x43c   : > { %1822 = vmatpush3.msra.mxu1 %v926_v42 }
 0x43d   : > { %1826 = vmatprep.subr.mxu1 %v2141_v22 }
 0x43f   : > { %v1274_v50 = vpop.permute.xlu0 %1273 }
 0x440   : > { %v1406_v20 = vsel %vm484_vm2, %v1274_v50, 0.0 }
 0x44f   : > { %v831_v43 = vpop.xlane.xlu1 %830 }
 0x450   : > { %v832_v44 = vmax.f32 %v831_v43, 1e-16 }
 0x452   : > { %1960 = vrsqrt.f32 %v832_v44 }
 0x453   : > { %v875_v45 = vpop.xlane.xlu1 %874  ;;  %1962 = vrsqrt.f32 %v823_v51 }
 0x454   : > { %v876_v61 = vmul.f32 0.125, %v875_v45 }
 0x457   : > { %v1010_v46 = vpop.permute.xlu1 %1009 }
 0x458   : > { %v1145_v5 = vsel %vm484_vm2, %v1010_v46, 0.0 }
 0x45b   : > { %v1008_v47 = vpop.permute.xlu1 %1007 }
 0x45c   : > { %v1961_v48 = vpop.eup %1960  ;;  %v1140_v18 = vsel %vm484_vm2, %v1008_v47, 0.0 }
 0x45d   : > { %835 = vxpose.xlu0.b32.start.end [1/1] (short) (narrow) %v1961_v48, 8  ;;  %v1963_v54 = vpop.eup %1962 }
 0x45f   : > { %v1276_v49 = vpop.permute.xlu1 %1275 }
 0x460   : > { %1837 = vmatpush3.xpose.msk.msra.mxu0 %vm484_vm2, %v1276_v49 }
 0x461   : > { %1863 = vmatprep.subr.bf16.mxu0 %v2139_v19 }
 0x463   : > { %1839 = vmatmul.mubr.msk.f32.vlgmr.msra.gmra.mrb[6].mxu0 %vm484_vm2, %v1274_v50 }
 0x464   : > { %1854 = vmatprep.mubr.msk.f32.mxu0 %vm2140_vm1, %v2141_v22 }
 0x481   : > { %v733_v52 = vpop.f32.mrb[2].mxu1 }
 0x482   : > { %737 = vst.msk [vmem:[#allocation2] sm:$0xff] %vm484_vm2, %v733_v52  ;;  %v1815_v53 = vpop.f32.mrb[3].mxu1 }
 0x485   : > { %v812_v55 = vpop.f32.mrb[4].mxu1 }
 0x486   : > { %v834_v56 = vmul.f32 %v1963_v54, %v812_v55  ;;  %1093 = vrot.lane.b32.xlu0 %v2421_v57, %s2144_s23  ;;  %v1820_v58 = vpop.f32.mrb[5].mxu1  ;;  %v882_v63 = vmul.f32 0.125, %v812_v55  ;;  %v1411_v57 = vsel %vm484_vm2, %v1276_v49, 0.0 }
 0x488   : > { %v899_v60 = vpop.trf.xlu1 }
 0x489   : > { %v918_v62 = vrot.slane %v899_v60, %v2451_v15 }
 0x48a   : > { %1351 = vrot.lane.b32.xlu0 %v2428_v59, %s2143_s10 }
 0x48b   : > { %v919_v0 = vmul.f32 %v918_v62, %v876_v61 }
 0x48d   : > { %v920_v1 = vsub.f32 %v882_v63, %v919_v0 }
 0x48f   : > { %v922_v9 = vmul.f32 %v920_v1, %v2455_v28 }
 0x498   : > { %v1360_v3 = vpop.permute.xlu1 %1359 }
 0x499   : > { %v1362_v4 = vsel %vm484_vm2, %v1360_v3, 0.0 }
 0x49c   : > { %v1086_v13 = vpop.permute.xlu1 %1085 }
 0x49d   : > { %v1088_v16 = vsel %vm484_vm2, %v1086_v13, 0.0  ;;  %v1541_v13 = vld [vmem:[#allocation7 + $0x8] sm:$0xff] }
 0x4a9   : > { %1363 = vadd.xlane.f32.xlu0 %v1362_v4 }
 0x4ad   : > { %1146 = vadd.xlane.f32.xlu0 %v1145_v5 }
 0x4b1   : > { %1412 = vadd.xlane.f32.xlu0 %v1411_v57 }
 0x4dd   : > { %v851_v6 = vpop.trf.xlu0 }
 0x4de   : > { %v870_v7 = vrot.slane %v851_v6, %v2451_v15 }
 0x4e0   : > { %v871_v8 = vmul.f32 %v870_v7, %v834_v56 }
 0x4e2   : > { %v921_v59 = vmul.f32 %v871_v8, %v2457_v29 }
 0x4e4   : > { %v923_v10 = vadd.f32 %v922_v9, %v921_v59 }
 0x4e6   : > { %1824 = vmatmul.mubr.msk.f32.vlgmr.msra.gmra.mrb[6].mxu1 %vm484_vm2, %v923_v10 }
 0x4e7   : > { %1827 = vmatpush3.xpose.msk.msra.mxu1 %vm484_vm2, %v1010_v46  ;;  %1828 = vmatprep.mubr.msk.f32.mxu1 %vm2140_vm1, %v2141_v22 }
 0x4e8   : > { %1831 = vmatprep.subr.mxu1 %v2141_v22 }
 0x4ea   : > { %1829 = vmatmul.mubr.msk.f32.vlgmr.msra.gmra.mrb[8].mxu1 %vm484_vm2, %v1008_v47 }
 0x4eb   : > { %1833 = vmatprep.mubr.msk.f32.mxu1 %vm2140_vm1, %v2141_v22 }
 0x4f8   : > { %v1094_v11 = vpop.permute.xlu0 %1093 }
 0x4f9   : > { %v1096_v12 = vsel %vm484_vm2, %v1094_v11, 0.0 }
 0x4fa   : > { %1097 = vadd.xlane.f32.xlu1 %v1096_v12  ;;  %v1540_v12 = vld [vmem:[#allocation7] sm:$0xff] }
 0x4fc   : > { %v1352_v14 = vpop.permute.xlu0 %1351 }
 0x4fd   : > { %v1354_v17 = vsel %vm484_vm2, %v1352_v14, 0.0  ;;  %v1864_v14 = vpack.c.bf16 %v1541_v13, %v1540_v12 }
 0x4fe   : > { %1089 = vadd.xlane.f32.xlu1 %v1088_v16  ;;  %1355 = vadd.xlane.f32.xlu0 %v1354_v17  ;;  %v1542_v16 = vld [vmem:[#allocation7 + $0x10] sm:$0xff]  ;;  %v1543_v17 = vld [vmem:[#allocation7 + $0x18] sm:$0xff] }
 0x4ff   : > { %1865 = vmatpush3.bf16.msra.mxu0 %v1864_v14 }
 0x500   : > { %1866 = vmatprep.subr.bf16.mxu0 %v2139_v19  ;;  %v1755_v19 = vld [vmem:[%s2594_s5] ss:$0 sm:$0xff] }
 0x502   : > { %1141 = vadd.xlane.f32.xlu1 %v1140_v18  ;;  %1407 = vadd.xlane.f32.xlu0 %v1406_v20  ;;  %v1867_v18 = vpack.c.bf16 %v1543_v17, %v1542_v16 }
 0x504   : > { %1868 = vmatpush3.bf16.msra.mxu0 %v1867_v18 }
 0x513   : > { %1191 = vrot.lane.b32.xlu1 %v2442_v2, %s2144_s23  ;;  %s2062_s23 = sshll.u32 %s2148_s0, 4  ;;  %s2063_s23 = int_to_ptr.vmem [resolvable:$false] %s2062_s23 }
 0x514   : > { %p2065_p2 = scmp.lt.s32.totalorder %s2546_s9, %s2063_s23 }
 0x518   : > { %1457 = vrot.lane.b32.xlu0 %v2442_v2, %s2143_s10  ;;  %s2058_s10 = scalar_lea.vmem %s2546_s9, 128 }
 0x519   : > { %p2059_p10 = scmp.ne.s32.totalorder %s2546_s9, %s2058_s10 }
 0x51b   : > { %p2060_p4 = pnand %p2059_p10, %p2621_p1 }
 0x51d   : > { %p2061_p0 = pneg %p2060_p4 }
 0x536   : > { %v1364_v21 = vpop.xlane.xlu0 %1363  ;;  %v1347_v23 = vpop.f32.mrb[6].mxu0 }
 0x537   : > { %v1365_v24 = vmax.f32 %v1364_v21, 1e-16  ;;  %v1840_v25 = vpop.f32.mrb[7].mxu0  ;;  %v1415_v57 = vmul.f32 0.125, %v1347_v23 }
 0x539   : > { %1964 = vrsqrt.f32 %v1365_v24 }
 0x53a   : > { %v1147_v26 = vpop.xlane.xlu0 %1146 }
 0x53b   : > { %v1148_v27 = vmul.f32 0.125, %v1147_v26 }
 0x53d   : > { %1150 = vxpose.xlu1.b32.start.end [1/1] (short) (narrow) %v1148_v27, 8 }
 0x53e   : > { %v1413_v37 = vpop.xlane.xlu0 %1412 }
 0x53f   : > { %v1414_v2 = vmul.f32 0.125, %v1413_v37 }
 0x543   : > { %v1965_v30 = vpop.eup %1964 }
 0x544   : > { %1368 = vxpose.xlu1.b32.start.end [1/1] (short) (narrow) %v1965_v30, 8 }
 0x587   : > { %v1098_v31 = vpop.xlane.xlu1 %1097 }
 0x588   : > { %v1099_v32 = vmax.f32 %v1098_v31, 1e-16 }
 0x58a   : > { %1966 = vrsqrt.f32 %v1099_v32 }
 0x58b   : > { %v1090_v33 = vpop.xlane.xlu1 %1089  ;;  %v1356_v51 = vpop.xlane.xlu0 %1355 }
 0x58c   : > { %v1091_v38 = vmax.f32 %v1090_v33, 1e-16  ;;  %v1357_v52 = vmax.f32 %v1356_v51, 1e-16 }
 0x58e   : > { %1968 = vrsqrt.f32 %v1091_v38 }
 0x58f   : > { %v1142_v34 = vpop.xlane.xlu1 %1141  ;;  %v1408_v53 = vpop.xlane.xlu0 %1407  ;;  %1970 = vrsqrt.f32 %v1357_v52 }
 0x590   : > { %v1143_v44 = vmul.f32 0.125, %v1142_v34  ;;  %v1409_v63 = vmul.f32 0.125, %v1408_v53 }
 0x593   : > { %v1192_v35 = vpop.permute.xlu1 %1191  ;;  %v1458_v54 = vpop.permute.xlu0 %1457 }
 0x594   : > { %v1967_v36 = vpop.eup %1966  ;;  %1832 = vmatpush3.msra.mxu1 %v1192_v35 }
 0x595   : > { %1102 = vxpose.xlu0.b32.start.end [1/1] (short) (narrow) %v1967_v36, 8  ;;  %1841 = vmatprep.subr.mxu1 %v2141_v22 }
 0x598   : > { %v1969_v41 = vpop.eup %1968 }
 0x599   : > { %1416 = vxpose.xlu0.b32.start.end [1/1] (short) (narrow) %v1414_v2, 8  ;;  %v1971_v60 = vpop.eup %1970 }
 0x59a   : > { %v1367_v3 = vmul.f32 %v1971_v60, %v1347_v23 }
 0x5b9   : > { %v997_v39 = vpop.f32.mrb[6].mxu1 }
 0x5ba   : > { %v1825_v40 = vpop.f32.mrb[7].mxu1 }
 0x5bd   : > { %v1166_v42 = vpop.trf.xlu1  ;;  %v1081_v43 = vpop.f32.mrb[8].mxu1 }
 0x5be   : > { %v1185_v45 = vrot.slane %v1166_v42, %v2451_v15  ;;  %v1101_v46 = vmul.f32 %v1969_v41, %v1081_v43  ;;  %v1830_v47 = vpop.f32.mrb[9].mxu1  ;;  %v1149_v49 = vmul.f32 0.125, %v1081_v43 }
 0x5c0   : > { %v1186_v48 = vmul.f32 %v1185_v45, %v1143_v44 }
 0x5c2   : > { %v1187_v50 = vsub.f32 %v1149_v49, %v1186_v48  ;;  %1002 = vrot.lane.b32.xlu0 %v997_v39, %s2145_s20  ;;  %s2064_s20 = scalar_lea.vmem %s2063_s23, 256 }
 0x5c3   : > { %p2066_p5 = scmp.lt.s32.totalorder %s2064_s20, %s2058_s10 }
 0x5c4   : > { %v1384_v55 = vpop.trf.xlu1  ;;  %v1189_v1 = vmul.f32 %v1187_v50, %v2455_v28 }
 0x5c5   : > { %v1403_v61 = vrot.slane %v1384_v55, %v2451_v15  ;;  %p2067_p11 = por %p2066_p5, %p2065_p2 }
 0x5c7   : > { %v1404_v6 = vmul.f32 %v1403_v61, %v1367_v3  ;;  %p2068_p12 = pnand %p2067_p11, %p2061_p0 }
 0x5c9   : > { %v1454_v59 = vmul.f32 %v1404_v6, %v2457_v29 }
 0x615   : > { %v1118_v56 = vpop.trf.xlu0 }
 0x616   : > { %v1137_v58 = vrot.slane %v1118_v56, %v2451_v15 }
 0x618   : > { %v1138_v62 = vmul.f32 %v1137_v58, %v1101_v46 }
 0x619   : > { %v1432_v0 = vpop.trf.xlu0 }
 0x61a   : > { %v1188_v4 = vmul.f32 %v1138_v62, %v2457_v29  ;;  %v1451_v5 = vrot.slane %v1432_v0, %v2451_v15 }
 0x61c   : > { %v1190_v7 = vadd.f32 %v1189_v1, %v1188_v4  ;;  %v1452_v8 = vmul.f32 %v1451_v5, %v1409_v63 }
 0x61e   : > { %v1453_v9 = vsub.f32 %v1415_v57, %v1452_v8  ;;  %1834 = vmatmul.mubr.msk.f32.vlgmr.msra.gmra.mrb[10].mxu1 %vm484_vm2, %v1190_v7 }
 0x61f   : > { %1842 = vmatpush3.msra.mxu1 %v1458_v54  ;;  %1843 = vmatprep.mubr.msk.f32.mxu1 %vm2140_vm1, %v2141_v22 }
 0x620   : > { %v1455_v10 = vmul.f32 %v1453_v9, %v2455_v28 }
 0x622   : > { %v1456_v11 = vadd.f32 %v1455_v10, %v1454_v59 }
 0x624   : > { %1844 = vmatmul.mubr.msk.f32.vlgmr.msra.gmra.mrb[12].mxu1 %vm484_vm2, %v1456_v11 }
 0x634   : > { %v1003_v15 = vpop.permute.xlu0 %1002 }
 0x635   : > { %1006 = vst.msk [vmem:[#allocation2] sm:$0xff] %vm1005_vm3, %v1003_v15 }
 0x6f1   : > { %v1263_v22 = vpop.f32.mrb[10].mxu1 }
 0x6f2   : > { %1268 = vrot.lane.b32.xlu1 %v1263_v22, %s2146_s21  ;;  %v1835_v28 = vpop.f32.mrb[11].mxu1 }
 0x6f7   : > { %v1529_v29 = vpop.f32.mrb[12].mxu1 }
 0x6f8   : > { %1534 = vrot.lane.b32.xlu1 %v1529_v29, %s2147_s25  ;;  %v1845_v20 = vpop.f32.mrb[13].mxu1 }
 0x764   : > { %v1269_v21 = vpop.permute.xlu1 %1268 }
 0x765   : > { %1272 = vst.msk [vmem:[#allocation2] sm:$0xff] %vm1271_vm4, %v1269_v21 }
 0x76a   : > { %v1535_v23 = vpop.permute.xlu1 %1534 }
 0x76b   : > { %1538 = vst.msk [vmem:[#allocation2] sm:$0xff] %vm1537_vm5, %v1535_v23 }
 0x772   : > { %v1539_v24 = vld [vmem:[#allocation2] sm:$0xff] }
 0x773   : > { %1855 = vmatmul.mubr.msk.f32.vlgmr.msra.gmra.mrb[8].mxu0 %vm330_vm0, %v1539_v24 }
 0x846   : > { %v1620_v25 = vpop.f32.mrb[8].mxu0 }
 0x847   : > { %v1621_v26 = vadd.f32 %v1755_v19, %v1620_v25  ;;  %v1856_v27 = vpop.f32.mrb[9].mxu0 }
 0x849   : > { %1624 = vst.msk [vmem:[%s324_s24] sm:$0xff] %vm330_vm0, %v1621_v26 }
 0x84a   : > { %2071 = shalt.err (!%p2068_p12)
}
 0x84b   : > { %s2072_s22 = scalar_lea.hbm %s2544_s12, 128  ;;  %s2076_s16 = scalar_lea.hbm %s2596_s7, 256 }
 0x84c   : > { %p2073_p3 = scmp.ne.s32.totalorder %s2544_s12, %s2072_s22  ;;  %p2077_p7 = scmp.lt.u32.totalorder %s2544_s12, %s2596_s7 }
 0x84d   : > { %p2078_p9 = scmp.lt.u32.totalorder %s2076_s16, %s2072_s22  ;;  %p2080_p10 = scmp.lt.u32.totalorder %s2072_s22, %s2544_s12 }
 0x84e   : > { %p2074_p6 = pnand %p2073_p3, %p2621_p1 }
 0x84f   : > { %p2079_p8 = por %p2078_p9, %p2077_p7 }
 0x850   : > { %p2075_p13 = pneg %p2074_p6 }
 0x851   : > { %p2081_p4 = por %p2080_p10, %p2079_p8 }
 0x853   : > { %p2082_p0 = pnand %p2081_p4, %p2075_p13 }
 0x855   : > { %2085 = shalt.err (!%p2082_p0)
}
 0x856   : > { %1882 = dma.vmem_to_hbm [thread:$0]  (%p2621_p1), %s2546_s9, 128, %s2544_s12, %s1626_s30  }
 0x857 PF: > { %s1651_s13 = sand.u32 1, %s2120_s26   ;;  %p2622_p2 = scmp.ne.s32.totalorder %s2607_s15, 0 }
 0x858   : > { %p2623_p5 = scmp.ge.s32.totalorder %s2132_s29, 2  ;;  %s1652_s24 = scalar_lea.sflag [#allocation6], %s1651_s13 }
 0x85a   : > { %p1896_p11 = pnand %p2623_p5, %p2622_p2 }
 0x85c   : > { %2115 = dma.done.wait (!%p1896_p11), %s1652_s24, 128  }
 0x85d   : > { %2117 = vsyncadd (!%p1896_p11), %s1652_s24, 4294967168  ;;  %s2624_s17 = sld [smem:[#allocation15_spill]]  ;;  %p20_p12 = scmp.ge.s32.totalorder %s2217_s8, 4  }
 0x85e   : > { %s2625_s26 = smov %s2124_s27  ;;  %s2626_s27 = smov %s2128_s28 }
 0x85f   : > { %s2628_s29 = smov %s2217_s8  ;;  %22 = sbr.rel (!%p20_p12) target bundleno = 7 (0x7), region = 100 }
 0x863   : > { %s2627_s28 = smov %s2624_s17 }
 0x866   :  { %1657 = vsyncpa [#allocation5], 1 }
 0x867   :  { %1659 = vsyncpa [#allocation5 + $0x1], 1 }
 0x868   :  { %1660 = vsyncpa [#allocation8], 1 }
 0x869   :  { %1661 = vsyncpa [#allocation6], 1 }
 0x86a   :  { %1663 = vsyncpa [#allocation6 + $0x1], 1 }

</bundles_post_ra>
